<compile_context>
chip_gen: v5e
topology: v5e:2x2
jax: 0.10.0
libtpu: 0.0.40
codegen_flags: <defaults>
</compile_context>

<pallas_src>
import functools

import jax
import jax.numpy as jnp
from jax.experimental import pallas as pl
from jax.experimental.pallas import tpu as pltpu

IN_DIM = 68
HID = 128
OUT_DIM = 13
PAD_OUT = 128   # lane-dense internal width for the last layer
NEG_INF = -1e30


def _round_up(x, m):
    return ((x + m - 1) // m) * m


def policy_kernel(x_ref, w1_ref, b1_ref, w2_ref, b2_ref, w3_ref, b3_ref, out_ref):
    # Cast x to bf16 in-kernel (free VPU work in a mem-bound kernel).
    x = x_ref[...].astype(jnp.bfloat16)

    # Layer 1: (TB,68)bf16 @ (68,128)bf16 -> f32 acc; bias + ReLU in f32,
    # bf16 cast folded into the same elementwise pass.
    h1 = jnp.dot(x, w1_ref[...], preferred_element_type=jnp.float32)
    h1 = jnp.maximum(h1 + b1_ref[...], 0.0).astype(jnp.bfloat16)

    # Layer 2.
    h2 = jnp.dot(h1, w2_ref[...], preferred_element_type=jnp.float32)
    h2 = jnp.maximum(h2 + b2_ref[...], 0.0).astype(jnp.bfloat16)

    # Output layer, lane-dense 128 internally: padded w3 columns are zero and padded
    # b3 entries are -1e30, so padded logits vanish in the softmax (exp underflows).
    logits = jnp.dot(h2, w3_ref[...], preferred_element_type=jnp.float32) + b3_ref[...]

    # Numerically stable softmax over the lane-dense action dim.
    m = jnp.max(logits, axis=-1, keepdims=True)
    e = jnp.exp(logits - m)
    denom = jnp.sum(e, axis=-1, keepdims=True)
    # EUP approximate reciprocal + one Newton step -> full f32 accuracy normalization.
    inv = pl.reciprocal(denom, approx=True)
    inv = inv * (2.0 - denom * inv)
    probs = e * inv

    # Narrow store: only the 13 real action columns leave VMEM.
    out_ref[...] = probs[:, :OUT_DIM].astype(out_ref.dtype)


@functools.partial(jax.jit, static_argnames=("tb",))
def policy_forward(x, params, tb=2048):
    """x: (B, 68) float32 -> (B, 13) float32 softmax probabilities."""
    w1, b1, w2, b2, w3, b3 = params
    B = x.shape[0]

    # Batch tile: multiple of 8, capped at `tb`. No batch padding: Pallas masks the
    # partial last block (garbage rows never reach HBM).
    TB = min(tb, _round_up(B, 8))
    grid = (pl.cdiv(B, TB),)

    x_f32 = x.astype(jnp.float32)

    # Weight prep (tiny one-time ops; constant-folded under jit for static params).
    w1_b = w1.astype(jnp.bfloat16)                                     # (68, 128)
    w2_b = w2.astype(jnp.bfloat16)                                     # (128, 128)
    w3_b = jnp.pad(w3, ((0, 0), (0, PAD_OUT - OUT_DIM))).astype(jnp.bfloat16)
    b1_f = b1.reshape(1, HID).astype(jnp.float32)
    b2_f = b2.reshape(1, HID).astype(jnp.float32)
    b3_f = jnp.pad(b3.reshape(1, OUT_DIM), ((0, 0), (0, PAD_OUT - OUT_DIM)),
                   constant_values=NEG_INF).astype(jnp.float32)

    resident = lambda shape: pl.BlockSpec(shape, lambda i: (0, 0))  # VMEM-resident

    weight_bytes = ((w1_b.size + w2_b.size + w3_b.size) * 2
                    + (b1_f.size + b2_f.size + b3_f.size) * 4)
    cost = pl.CostEstimate(
        flops=2 * B * (IN_DIM * HID + HID * HID + HID * PAD_OUT),
        transcendentals=B * PAD_OUT,
        bytes_accessed=B * IN_DIM * 4 + B * OUT_DIM * 4 + weight_bytes,
    )

    out = pl.pallas_call(
        policy_kernel,
        out_shape=jax.ShapeDtypeStruct((B, OUT_DIM), jnp.float32),
        grid=grid,
        in_specs=[
            pl.BlockSpec((TB, IN_DIM), lambda i: (i, 0)),   # x: pipelined over batch
            resident((IN_DIM, HID)),                        # w1
            resident((1, HID)),                             # b1
            resident((HID, HID)),                           # w2
            resident((1, HID)),                             # b2
            resident((HID, PAD_OUT)),                       # w3 (padded 13 -> 128)
            resident((1, PAD_OUT)),                         # b3 (padded with -1e30)
        ],
        out_specs=pl.BlockSpec((TB, OUT_DIM), lambda i: (i, 0)),  # narrow HBM writeback
        compiler_params=pltpu.CompilerParams(
            dimension_semantics=("parallel",)),
        cost_estimate=cost,
    )(x_f32, w1_b, b1_f, w2_b, b2_f, w3_b, b3_f)

    return out


def init_params(key):
    """Deterministic init mimicking PyTorch nn.Linear default (uniform(-1/sqrt(in), 1/sqrt(in)))."""
    ks = jax.random.split(key, 6)

    def linear(kw, kb, fan_in, fan_out):
        bound = 1.0 / jnp.sqrt(jnp.float32(fan_in))
        w = jax.random.uniform(kw, (fan_in, fan_out), jnp.float32, -bound, bound)
        b = jax.random.uniform(kb, (1, fan_out), jnp.float32, -bound, bound)
        return w, b

    w1, b1 = linear(ks[0], ks[1], IN_DIM, HID)
    w2, b2 = linear(ks[2], ks[3], HID, HID)
    w3, b3 = linear(ks[4], ks[5], HID, OUT_DIM)
    return (w1, b1, w2, b2, w3, b3)


def reference_forward(x, params):
    w1, b1, w2, b2, w3, b3 = params
    h = jnp.maximum(x @ w1 + b1, 0.0)
    h = jnp.maximum(h @ w2 + b2, 0.0)
    logits = h @ w3 + b3
    return jax.nn.softmax(logits, axis=-1)


if __name__ == "__main__":
    key = jax.random.PRNGKey(0)
    k_params, k_x = jax.random.split(key)

    params = init_params(k_params)
    B = 8
    x = jax.random.normal(k_x, (B, IN_DIM), jnp.float32)

    out = policy_forward(x, params)
    out = jax.block_until_ready(out)

    ref = reference_forward(x, params)
    assert out.shape == (B, OUT_DIM)
    # bf16 matmul operands (f32 accumulation) -> looser tolerance on probabilities.
    assert jnp.allclose(out, ref, atol=2e-2, rtol=2e-2)
    # Newton-refined reciprocal -> rows sum to 1 within f32 rounding.
    assert jnp.allclose(jnp.sum(out, axis=-1), 1.0, atol=1e-3)

    print("KERNEL_OK")
</pallas_src>

<mosaic_0001>
module attributes {stable_mosaic.version = 11 : i64} {
  func.func @policy_kernel(%arg0: i32, %arg1: memref<8x68xf32, #tpu.memory_space<vmem>>, %arg2: memref<68x128xbf16, #tpu.memory_space<vmem>>, %arg3: memref<1x128xf32, #tpu.memory_space<vmem>>, %arg4: memref<128x128xbf16, #tpu.memory_space<vmem>>, %arg5: memref<1x128xf32, #tpu.memory_space<vmem>>, %arg6: memref<128x128xbf16, #tpu.memory_space<vmem>>, %arg7: memref<1x128xf32, #tpu.memory_space<vmem>>, %arg8: memref<8x13xf32, #tpu.memory_space<vmem>>) attributes {dimension_semantics = [#tpu.dimension_semantics<parallel>], iteration_bounds = array<i64: 1>, scalar_prefetch = 0 : i64, scratch_operands = 0 : i64, tpu.core_type = #tpu.core_type<tc>, window_params = [{transform_indices = @transform_0, window_bounds = array<i64: 8, 68>}, {pipeline_mode = #tpu.pipeline_mode<synchronous>, transform_indices = @transform_1, window_bounds = array<i64: 68, 128>}, {pipeline_mode = #tpu.pipeline_mode<synchronous>, transform_indices = @transform_2, window_bounds = array<i64: 1, 128>}, {pipeline_mode = #tpu.pipeline_mode<synchronous>, transform_indices = @transform_3, window_bounds = array<i64: 128, 128>}, {pipeline_mode = #tpu.pipeline_mode<synchronous>, transform_indices = @transform_4, window_bounds = array<i64: 1, 128>}, {pipeline_mode = #tpu.pipeline_mode<synchronous>, transform_indices = @transform_5, window_bounds = array<i64: 128, 128>}, {pipeline_mode = #tpu.pipeline_mode<synchronous>, transform_indices = @transform_6, window_bounds = array<i64: 1, 128>}, {transform_indices = @transform_7, window_bounds = array<i64: 8, 13>}]} {
    %c0 = arith.constant 0 : index
    %c0_0 = arith.constant 0 : index
    %0 = vector.load %arg1[%c0, %c0_0] : memref<8x68xf32, #tpu.memory_space<vmem>>, vector<8x68xf32>
    %1 = arith.truncf %0 : vector<8x68xf32> to vector<8x68xbf16>
    %c0_1 = arith.constant 0 : index
    %c0_2 = arith.constant 0 : index
    %2 = vector.load %arg2[%c0_1, %c0_2] : memref<68x128xbf16, #tpu.memory_space<vmem>>, vector<68x128xbf16>
    %cst = arith.constant dense<0.000000e+00> : vector<8x128xf32>
    %3 = tpu.matmul %1, %2, %cst {dimension_numbers = #tpu.dot_dimension_numbers<[1], [0], [0], [1], [0, 0, 1, 1], [], []>} : vector<8x68xbf16>, vector<68x128xbf16>, vector<8x128xf32> -> vector<8x128xf32>
    %c0_3 = arith.constant 0 : index
    %c0_4 = arith.constant 0 : index
    %4 = vector.load %arg3[%c0_3, %c0_4] : memref<1x128xf32, #tpu.memory_space<vmem>>, vector<1x128xf32>
    %5 = vector.broadcast %4 : vector<1x128xf32> to vector<8x128xf32>
    %6 = arith.addf %3, %5 : vector<8x128xf32>
    %cst_5 = arith.constant 0.000000e+00 : f32
    %7 = vector.broadcast %cst_5 : f32 to vector<8x128xf32>
    %8 = arith.maximumf %6, %7 : vector<8x128xf32>
    %9 = arith.truncf %8 : vector<8x128xf32> to vector<8x128xbf16>
    %c0_6 = arith.constant 0 : index
    %c0_7 = arith.constant 0 : index
    %10 = vector.load %arg4[%c0_6, %c0_7] : memref<128x128xbf16, #tpu.memory_space<vmem>>, vector<128x128xbf16>
    %cst_8 = arith.constant dense<0.000000e+00> : vector<8x128xf32>
    %11 = tpu.matmul %9, %10, %cst_8 {dimension_numbers = #tpu.dot_dimension_numbers<[1], [0], [0], [1], [0, 0, 1, 1], [], []>} : vector<8x128xbf16>, vector<128x128xbf16>, vector<8x128xf32> -> vector<8x128xf32>
    %c0_9 = arith.constant 0 : index
    %c0_10 = arith.constant 0 : index
    %12 = vector.load %arg5[%c0_9, %c0_10] : memref<1x128xf32, #tpu.memory_space<vmem>>, vector<1x128xf32>
    %13 = vector.broadcast %12 : vector<1x128xf32> to vector<8x128xf32>
    %14 = arith.addf %11, %13 : vector<8x128xf32>
    %cst_11 = arith.constant 0.000000e+00 : f32
    %15 = vector.broadcast %cst_11 : f32 to vector<8x128xf32>
    %16 = arith.maximumf %14, %15 : vector<8x128xf32>
    %17 = arith.truncf %16 : vector<8x128xf32> to vector<8x128xbf16>
    %c0_12 = arith.constant 0 : index
    %c0_13 = arith.constant 0 : index
    %18 = vector.load %arg6[%c0_12, %c0_13] : memref<128x128xbf16, #tpu.memory_space<vmem>>, vector<128x128xbf16>
    %cst_14 = arith.constant dense<0.000000e+00> : vector<8x128xf32>
    %19 = tpu.matmul %17, %18, %cst_14 {dimension_numbers = #tpu.dot_dimension_numbers<[1], [0], [0], [1], [0, 0, 1, 1], [], []>} : vector<8x128xbf16>, vector<128x128xbf16>, vector<8x128xf32> -> vector<8x128xf32>
    %c0_15 = arith.constant 0 : index
    %c0_16 = arith.constant 0 : index
    %20 = vector.load %arg7[%c0_15, %c0_16] : memref<1x128xf32, #tpu.memory_space<vmem>>, vector<1x128xf32>
    %21 = vector.broadcast %20 : vector<1x128xf32> to vector<8x128xf32>
    %22 = arith.addf %19, %21 : vector<8x128xf32>
    %cst_17 = arith.constant dense<0xFF800000> : vector<8xf32>
    %23 = vector.multi_reduction <maximumf>, %22, %cst_17 [1] : vector<8x128xf32> to vector<8xf32>
    %24 = vector.shape_cast %23 : vector<8xf32> to vector<8x1xf32>
    %25 = vector.broadcast %24 : vector<8x1xf32> to vector<8x128xf32>
    %26 = arith.subf %22, %25 : vector<8x128xf32>
    %27 = math.exp %26 : vector<8x128xf32>
    %cst_18 = arith.constant dense<0.000000e+00> : vector<8xf32>
    %28 = vector.multi_reduction <add>, %27, %cst_18 [1] : vector<8x128xf32> to vector<8xf32>
    %29 = vector.shape_cast %28 : vector<8xf32> to vector<8x1xf32>
    %30 = tpu.reciprocal %29 {approx = true} : vector<8x1xf32> -> vector<8x1xf32>
    %31 = arith.mulf %29, %30 : vector<8x1xf32>
    %cst_19 = arith.constant 2.000000e+00 : f32
    %32 = vector.broadcast %cst_19 : f32 to vector<8x1xf32>
    %33 = arith.subf %32, %31 : vector<8x1xf32>
    %34 = arith.mulf %30, %33 : vector<8x1xf32>
    %35 = vector.broadcast %34 : vector<8x1xf32> to vector<8x128xf32>
    %36 = arith.mulf %27, %35 : vector<8x128xf32>
    %37 = vector.extract_strided_slice %36 {offsets = [0, 0], sizes = [8, 13], strides = [1, 1]} : vector<8x128xf32> to vector<8x13xf32>
    %c0_20 = arith.constant 0 : index
    %c0_21 = arith.constant 0 : index
    %38 = vector.load %arg8[%c0_20, %c0_21] : memref<8x13xf32, #tpu.memory_space<vmem>>, vector<8x13xf32>
    tpu.vector_store %arg8[%c0_20, %c0_21], %37 {strides = array<i32>} : memref<8x13xf32, #tpu.memory_space<vmem>>, vector<8x13xf32>,
    return
  }
  func.func @transform_0(%arg0: i32) -> (i32, i32) {
    %c0_i32 = arith.constant 0 : i32
    %c0_i32_0 = arith.constant 0 : i32
    return %arg0, %c0_i32 : i32, i32
  }
  func.func @transform_1(%arg0: i32) -> (i32, i32) {
    %c0_i32 = arith.constant 0 : i32
    %c0_i32_0 = arith.constant 0 : i32
    %c0_i32_1 = arith.constant 0 : i32
    return %c0_i32, %c0_i32_0 : i32, i32
  }
  func.func @transform_2(%arg0: i32) -> (i32, i32) {
    %c0_i32 = arith.constant 0 : i32
    %c0_i32_0 = arith.constant 0 : i32
    %c0_i32_1 = arith.constant 0 : i32
    return %c0_i32, %c0_i32_0 : i32, i32
  }
  func.func @transform_3(%arg0: i32) -> (i32, i32) {
    %c0_i32 = arith.constant 0 : i32
    %c0_i32_0 = arith.constant 0 : i32
    %c0_i32_1 = arith.constant 0 : i32
    return %c0_i32, %c0_i32_0 : i32, i32
  }
  func.func @transform_4(%arg0: i32) -> (i32, i32) {
    %c0_i32 = arith.constant 0 : i32
    %c0_i32_0 = arith.constant 0 : i32
    %c0_i32_1 = arith.constant 0 : i32
    return %c0_i32, %c0_i32_0 : i32, i32
  }
  func.func @transform_5(%arg0: i32) -> (i32, i32) {
    %c0_i32 = arith.constant 0 : i32
    %c0_i32_0 = arith.constant 0 : i32
    %c0_i32_1 = arith.constant 0 : i32
    return %c0_i32, %c0_i32_0 : i32, i32
  }
  func.func @transform_6(%arg0: i32) -> (i32, i32) {
    %c0_i32 = arith.constant 0 : i32
    %c0_i32_0 = arith.constant 0 : i32
    %c0_i32_1 = arith.constant 0 : i32
    return %c0_i32, %c0_i32_0 : i32, i32
  }
  func.func @transform_7(%arg0: i32) -> (i32, i32) {
    %c0_i32 = arith.constant 0 : i32
    %c0_i32_0 = arith.constant 0 : i32
    return %arg0, %c0_i32 : i32, i32
  }
}

</mosaic_0001>

<bundles_post_ra>
// kernel: policy_forward.1
= control target key start
LH: loop header
LB: loop body
LE: loop exit
PB: predicated region body
PF: predicated region fallthrough
CT: control target
= control target key end

     0   :  { %vm74_vm0 = vcmask 1041408   ;;  %s541_s0 = inlined_call_operand.vmem [shape: f32[8,68], index: 0, kind: input, shape index: {}]   ;;  %s542_s1 = inlined_call_operand.vmem [shape: bf16[68,128], index: 1, kind: input, shape index: {}]   ;;  %s543_s2 = inlined_call_operand.vmem [shape: f32[1,128], index: 2, kind: input, shape index: {}]   ;;  %s544_s3 = inlined_call_operand.vmem [shape: bf16[128,128], index: 3, kind: input, shape index: {}]   ;;  %s545_s4 = inlined_call_operand.vmem [shape: f32[1,128], index: 4, kind: input, shape index: {}]   ;;  %s546_s5 = inlined_call_operand.vmem [shape: bf16[128,128], index: 5, kind: input, shape index: {}]   ;;  %s547_s6 = inlined_call_operand.vmem [shape: f32[1,128], index: 6, kind: input, shape index: {}]   ;;  %s548_s7 = inlined_call_operand.hbm [shape: f32[8,13], index: 7, kind: output, shape index: {}]  }
   0x1   :  { %v38_v0 = vld [vmem:[%s542_s1 + $0x20] sm:$0x3]  ;;  %v379_v2 = vld [vmem:[%s544_s3 + $0x38] sm:$0xff]  ;;  %v378_v4 = vld [vmem:[%s544_s3 + $0x30] sm:$0xff] }
   0x2   :  { %v60_v1 = vunpack.c.l.b16 %v38_v0  ;;  %161 = vmatpush.bf16.msra.mxu1 %v379_v2 }
   0x4   :  { %v65_v3 = vpack.c.b16 %v60_v1, %v60_v1 }
   0x6   :  { %v76_v5 = vsel %vm74_vm0, %v65_v3, 0 }
   0x7   :  { %12 = vsyncpa [#allocation3], 0  ;;  %81 = vmatpush.bf16.msra.mxu0 %v76_v5  ;;  %v371_v6 = vld [vmem:[%s542_s1 + $0x18] sm:$0xff]  ;;  %162 = vmatpush.bf16.msra.mxu1 %v378_v4  ;;  %v377_v7 = vld [vmem:[%s544_s3 + $0x28] sm:$0xff]  ;;  %vm70_vm1 = vcmask 556032   ;;  %vm269_vm2 = vcmask 105472  }
   0x8   :  { %v370_v8 = vld [vmem:[%s542_s1 + $0x10] sm:$0xff]  ;;  %v376_v9 = vld [vmem:[%s544_s3 + $0x20] sm:$0xff]  ;;  %v369_v10 = vld [vmem:[%s542_s1 + $0x8] sm:$0xff] }
   0x9   :  { %v375_v11 = vld [vmem:[%s544_s3 + $0x18] sm:$0xff]  ;;  %v368_v12 = vld [vmem:[%s542_s1] sm:$0xff]  ;;  %v374_v14 = vld [vmem:[%s544_s3 + $0x10] sm:$0xff] }
   0xa   :  { %v28_v13 = vld [vmem:[%s541_s0] sm:$0xff]  ;;  %v373_v16 = vld [vmem:[%s544_s3 + $0x8] sm:$0xff]  ;;  %v387_v18 = vld [vmem:[%s546_s5 + $0x38] sm:$0xff] }
   0xb   :  { %82 = vmatpush.bf16.msra.mxu0 %v371_v6  ;;  %163 = vmatpush.bf16.msra.mxu1 %v377_v7  ;;  %v29_v15 = vpack.c.bf16 %v28_v13, %v28_v13  ;;  %v372_v17 = vld [vmem:[%s544_s3] sm:$0xff]  ;;  %v386_v19 = vld [vmem:[%s546_s5 + $0x30] sm:$0xff]  ;;  %v385_v20 = vld [vmem:[%s546_s5 + $0x28] sm:$0xff] }
   0xc   :  { %244 = vmatpush.bf16.msra.mxu2 %v387_v18  ;;  %v384_v21 = vld [vmem:[%s546_s5 + $0x20] sm:$0xff]  ;;  %v383_v22 = vld [vmem:[%s546_s5 + $0x18] sm:$0xff]  ;;  %v382_v23 = vld [vmem:[%s546_s5 + $0x10] sm:$0xff] }
   0xd   :  { %v389_v24 = vld [vmem:[%s543_s2] ss:$0 sm:$0xff]  ;;  %v381_v30 = vld [vmem:[%s546_s5 + $0x8] sm:$0xff] }
   0xe   :  { %v380_v31 = vld [vmem:[%s546_s5] sm:$0xff] }
   0xf   :  { %83 = vmatpush.bf16.msra.mxu0 %v370_v8  ;;  %164 = vmatpush.bf16.msra.mxu1 %v376_v9  ;;  %v390_v32 = vld [vmem:[%s545_s4] ss:$0 sm:$0xff]  ;;  %s422_s4 = smov [#allocation2]  }
  0x10   :  { %245 = vmatpush.bf16.msra.mxu2 %v386_v19  ;;  %v391_v38 = vld [vmem:[%s547_s6] ss:$0 sm:$0xff]  ;;  %s276_s5 = sshll.u32 %s422_s4, 4  ;;  %s278_s6 = sshll.u32 %s548_s7, 4  ;;  %s277_s5 = int_to_ptr.vmem [resolvable:$true] %s276_s5  ;;  %s279_s6 = int_to_ptr.hbm [resolvable:$true] %s278_s6 }
  0x13   :  { %84 = vmatpush.bf16.msra.mxu0 %v369_v10  ;;  %165 = vmatpush.bf16.msra.mxu1 %v375_v11 }
  0x14   :  { %246 = vmatpush.bf16.msra.mxu2 %v385_v20 }
  0x17   :  { %85 = vmatpush.bf16.msra.mxu0 %v368_v12  ;;  %166 = vmatpush.bf16.msra.mxu1 %v374_v14 }
  0x18   :  { %247 = vmatpush.bf16.msra.mxu2 %v384_v21 }
  0x1a   :  { %303 = vmatmul.msk.bf16.vlgmr.msra.gmra.mxu0 %vm70_vm1, %v29_v15 }
  0x1b   :  { %167 = vmatpush.bf16.msra.mxu1 %v373_v16 }
  0x1c   :  { %248 = vmatpush.bf16.msra.mxu2 %v383_v22 }
  0x1f   :  { %168 = vmatpush.bf16.msra.mxu1 %v372_v17 }
  0x20   :  { %249 = vmatpush.bf16.msra.mxu2 %v382_v23 }
  0x24   :  { %250 = vmatpush.bf16.msra.mxu2 %v381_v30 }
  0x28   :  { %251 = vmatpush.bf16.msra.mxu2 %v380_v31 }
  0x97   :  { %v87_v25 = vpop.f32.mrf.mxu0 }
  0x98   :  { %v88_v26 = vadd.f32 %v389_v24, %v87_v25 }
  0x9a   :  { %v91_v27 = vmax.f32 %v88_v26, 0.0 }
  0x9c   :  { %v92_v28 = vpack.c.bf16 %v91_v27, %v91_v27 }
  0x9e   :  { %169 = vmatmul.bf16.vlgmr.msra.gmra.mxu1 %v92_v28 }
  0x9f   :  { %v89_v29 = vpop.f32.mrf.mxu0 }
 0x11b   :  { %v170_v33 = vpop.f32.mrf.mxu1 }
 0x11c   :  { %v171_v34 = vadd.f32 %v390_v32, %v170_v33 }
 0x11e   :  { %v174_v35 = vmax.f32 %v171_v34, 0.0 }
 0x120   :  { %v175_v36 = vpack.c.bf16 %v174_v35, %v174_v35 }
 0x122   :  { %252 = vmatmul.bf16.vlgmr.msra.gmra.mxu2 %v175_v36 }
 0x123   :  { %v172_v37 = vpop.f32.mrf.mxu1 }
 0x1a5   :  { %v253_v39 = vpop.f32.mrf.mxu2 }
 0x1a6   :  { %v254_v40 = vadd.f32 %v391_v38, %v253_v39 }
 0x1a8   :  { %257 = vmax.xlane.f32.xlu0 %v254_v40 }
 0x1ad   :  { %v255_v41 = vpop.f32.mrf.mxu2 }
 0x21b   :  { %v258_v42 = vpop.xlane.xlu0 %257 }
 0x21c   :  { %v259_v43 = vsub.f32 %v254_v40, %v258_v42 }
 0x21e   :  { %v260_v44 = vmul.f32 1.442695, %v259_v43 }
 0x220   :  { %392 = vpow2.f32 %v260_v44 }
 0x226   :  { %v393_v45 = vpop.eup %392 }
 0x227   :  { %262 = vadd.xlane.f32.xlu0 %v393_v45 }
 0x29a   :  { %v263_v46 = vpop.xlane.xlu0 %262 }
 0x29b   :  { %394 = vrcp.f32 %v263_v46 }
 0x2a1   :  { %v395_v47 = vpop.eup %394 }
 0x2a2   :  { %v265_v48 = vmul.f32 %v395_v47, %v263_v46 }
 0x2a4   :  { %v266_v49 = vsub.f32 2.0, %v265_v48 }
 0x2a6   :  { %v267_v50 = vmul.f32 %v395_v47, %v266_v49 }
 0x2a8   :  { %v268_v51 = vmul.f32 %v393_v45, %v267_v50 }
 0x2aa   :  { %270 = vst.msk [vmem:[#allocation2] sm:$0xff] %vm269_vm2, %v268_v51 }
 0x2ab   :  { %281 = dma.vmem_to_hbm [thread:$0]  %s277_s5, 128, %s279_s6, [#allocation3]  }
 0x2ac   :  { %420 = dma.done.wait [#allocation3], 128  }
 0x2ad   :  { %421 = vsyncadd [#allocation3], 4294967168 }
 0x2ae   :  { %286 = vsyncpa [#allocation3], 1 }

</bundles_post_ra>
